<compile_context>
chip_gen: v7x
topology: tpu7x:2x2x1
jax: 0.10.0
libtpu: 0.0.40
codegen_flags: <defaults>
</compile_context>

<pallas_src>
import functools

import jax
import jax.numpy as jnp
from jax.experimental import pallas as pl
from jax.experimental.pallas import tpu as pltpu

_LANE = 128
_TILE_B = 32768          # lanes per grid step; 2x32768 f32 tile = 256 KiB


def _oscillation_kernel(alpha_ref, z_ref, o_ref, *, dt2):
    # alpha_ref: SMEM (1,) f32
    # z_ref:     VMEM (2, tb) f32, rows = [y0; y1] (batch on lanes)
    # o_ref:     VMEM (1, tb) f32, lane-dense output
    coef = jnp.float32(2.0) - jnp.float32(dt2) * alpha_ref[0]
    o_ref[...] = coef * z_ref[1:2, :] - z_ref[0:1, :]


def oscillation_forward(z, dt, alpha, *, tile_b=_TILE_B):
    """z: [B, S] float32 (S >= 2), dt: python float, alpha: [1] float32."""
    z = jnp.asarray(z, jnp.float32)
    B, S = z.shape
    assert S >= 2, S
    alpha_arr = jnp.asarray(alpha, jnp.float32).reshape((1,))
    dt2 = float(dt) * float(dt)                       # trace-time constant

    # Layout plumbing (outside the kernel): keep only the 2 needed state
    # columns and put batch on the lane axis -> [2, B_pad].
    zt = z[:, :2].T                                   # [2, B]
    b_pad = pl.cdiv(B, _LANE) * _LANE                 # lane-align batch
    tb = min(tile_b, b_pad)
    b_pad = pl.cdiv(b_pad, tb) * tb                   # make tiles divide evenly
    if b_pad != B:
        zt = jnp.pad(zt, ((0, 0), (0, b_pad - B)))    # padded lanes -> 0, sliced off below

    out = pl.pallas_call(
        functools.partial(_oscillation_kernel, dt2=dt2),
        out_shape=jax.ShapeDtypeStruct((1, b_pad), jnp.float32),
        grid=(b_pad // tb,),
        in_specs=[
            pl.BlockSpec(memory_space=pltpu.MemorySpace.SMEM),   # alpha (whole array)
            pl.BlockSpec((2, tb), lambda i: (0, i)),             # [y0; y1] lane tile
        ],
        out_specs=pl.BlockSpec((1, tb), lambda i: (0, i)),       # lane-dense output
        compiler_params=pltpu.CompilerParams(
            dimension_semantics=("parallel",),                   # shard tiles across TCs (v7x)
        ),
    )(alpha_arr, zt)

    return out[0, :B].reshape(B, 1)


def oscillation_reference(z, dt, alpha):
    z = jnp.asarray(z, jnp.float32)
    y0 = z[:, 0:1]
    y1 = z[:, 1:2]
    return y1 + (y1 - y0) - jnp.float32(dt) * jnp.float32(dt) * alpha[0] * y1


if __name__ == "__main__":
    key = jax.random.PRNGKey(0)
    B, S = 8, 2                      # batch of oscillator states [y0, y1]
    z = jax.random.normal(key, (B, S), dtype=jnp.float32)
    dt = 0.1
    alpha = jnp.asarray([-0.5], dtype=jnp.float32)   # nn.Parameter init value

    out = jax.block_until_ready(oscillation_forward(z, dt, alpha))

    ref = oscillation_reference(z, dt, alpha)
    assert out.shape == (B, 1), out.shape
    assert jnp.allclose(out, ref, atol=1e-6, rtol=1e-6), (out, ref)

    print("KERNEL_OK")
</pallas_src>

<mosaic_0001>
module attributes {stable_mosaic.version = 11 : i64} {
  func.func @_oscillation_kernel(%arg0: i32, %arg1: memref<1xf32, #tpu.memory_space<smem>>, %arg2: memref<2x128xf32, #tpu.memory_space<vmem>>, %arg3: memref<1x128xf32, #tpu.memory_space<vmem>>) attributes {dimension_semantics = [#tpu.dimension_semantics<parallel>], iteration_bounds = array<i64: 1>, scalar_prefetch = 0 : i64, scratch_operands = 0 : i64, tpu.core_type = #tpu.core_type<tc>, window_params = [{transform_indices = @transform_0, window_bounds = array<i64: 1>}, {transform_indices = @transform_1, window_bounds = array<i64: 2, 128>}, {transform_indices = @transform_2, window_bounds = array<i64: 1, 128>}]} {
    %c0 = arith.constant 0 : index
    %0 = memref.load %arg1[%c0] : memref<1xf32, #tpu.memory_space<smem>>
    %cst = arith.constant 0.00999999977 : f32
    %1 = arith.mulf %cst, %0 : f32
    %cst_0 = arith.constant 2.000000e+00 : f32
    %2 = arith.subf %cst_0, %1 : f32
    %c1 = arith.constant 1 : index
    %c0_1 = arith.constant 0 : index
    %3 = vector.load %arg2[%c1, %c0_1] : memref<2x128xf32, #tpu.memory_space<vmem>>, vector<1x128xf32>
    %4 = vector.broadcast %2 : f32 to vector<1x128xf32>
    %5 = arith.mulf %4, %3 : vector<1x128xf32>
    %c0_2 = arith.constant 0 : index
    %c0_3 = arith.constant 0 : index
    %6 = vector.load %arg2[%c0_2, %c0_3] : memref<2x128xf32, #tpu.memory_space<vmem>>, vector<1x128xf32>
    %7 = arith.subf %5, %6 : vector<1x128xf32>
    %c0_4 = arith.constant 0 : index
    %c0_5 = arith.constant 0 : index
    %8 = vector.load %arg3[%c0_4, %c0_5] : memref<1x128xf32, #tpu.memory_space<vmem>>, vector<1x128xf32>
    tpu.vector_store %arg3[%c0_4, %c0_5], %7 {strides = array<i32>} : memref<1x128xf32, #tpu.memory_space<vmem>>, vector<1x128xf32>,
    return
  }
  func.func @transform_0(%arg0: i32) -> i32 {
    %c0_i32 = arith.constant 0 : i32
    %c0_i32_0 = arith.constant 0 : i32
    return %c0_i32 : i32
  }
  func.func @transform_1(%arg0: i32) -> (i32, i32) {
    %c0_i32 = arith.constant 0 : i32
    %c0_i32_0 = arith.constant 0 : i32
    return %c0_i32, %arg0 : i32, i32
  }
  func.func @transform_2(%arg0: i32) -> (i32, i32) {
    %c0_i32 = arith.constant 0 : i32
    %c0_i32_0 = arith.constant 0 : i32
    return %c0_i32, %arg0 : i32, i32
  }
}

</mosaic_0001>

<bundles_post_ra>
// kernel: tpu_custom_call.1
= control target key start
LH: loop header
LB: loop body
LE: loop exit
PB: predicated region body
PF: predicated region fallthrough
CT: control target
= control target key end

     0   :  { %s98_s0 = inlined_call_operand.<no memory space> [shape: f32[1], index: 0, kind: input, shape index: {}]   ;;  %s99_s1 = inlined_call_operand.vmem [shape: f32[2,128], index: 1, kind: input, shape index: {}]   ;;  %s100_s2 = inlined_call_operand.hbm [shape: f32[1,128], index: 2, kind: output, shape index: {}]  }
   0x1   :  { %s14_s11 = smul.f32 0.01, %s98_s0 }
   0x2   :  { %8 = vsyncpa [#allocation4], 0  ;;  %v16_v0 = vld [vmem:[%s99_s1 + $0x1] sm:$0x1]  ;;  %v19_v2 = vld [vmem:[%s99_s1] sm:$0x1] }
   0x3   :  { %s15_s12 = ssub.f32 2.0, %s14_s11  ;;  %s61_s17 = smov [#allocation3]  }
   0x4   :  { %s28_s18 = sshll.u32 %s61_s17, 4  ;;  %s29_s18 = int_to_ptr.vmem [resolvable:$true] %s28_s18 }
   0x5   :  { %v17_v1 = vstv %s15_s12  ;;  %s37_s19 = scalar_lea.vmem %s29_s18, 16  ;;  %s41_s0 = scalar_lea.vmem %s29_s18, 32 }
   0x6   :  { %v18_v3 = vmul.f32 %v17_v1, %v16_v0  ;;  %p38_p0 = scmp.ne.s32.totalorder %s29_s18, %s37_s19  ;;  %p42_p1 = scmp.lt.s32.totalorder %s29_s18, %s29_s18 }
   0x7   :  { %p43_p2 = scmp.lt.s32.totalorder %s41_s0, %s37_s19 }
   0x8   :  { %v20_v4 = vsub.f32 %v18_v3, %v19_v2 }
   0x9   :  { %p44_p3 = por %p43_p2, %p42_p1 }
   0xa   :  { %21 = vst [vmem:[#allocation3] sm:$0x1] %v20_v4 }
   0xb   :  { %p45_p4 = pnand %p44_p3, %p38_p0 }
   0xd   :  { %48 = shalt.err (!%p45_p4)
}
   0xe   :  { %s49_s22 = scalar_lea.hbm %s100_s2, 16 }
   0xf   :  { %p50_p5 = scmp.ne.s32.totalorder %s100_s2, %s49_s22  ;;  %p53_p6 = scmp.lt.u32.totalorder %s49_s22, %s100_s2 }
  0x11   :  { %p55_p7 = pnand %p53_p6, %p50_p5 }
  0x13   :  { %58 = shalt.err (!%p55_p7)
}
  0x14   :  { %31 = dma.vmem_to_hbm [thread:$0]  %s29_s18, 16, %s100_s2, [#allocation4]  }
  0x15   :  { %59 = dma.done.wait [#allocation4], 16  }
  0x16   :  { %60 = vsyncadd [#allocation4], 4294967280 }
  0x17   :  { %35 = vsyncpa [#allocation4], 1 }

</bundles_post_ra>
